<compile_context>
chip_gen: v5e
topology: v5e:2x2
jax: 0.10.0
libtpu: 0.0.40
codegen_flags: <defaults>
</compile_context>

<pallas_src>
import math

import jax
import jax.numpy as jnp
from jax.experimental import pallas as pl
from jax.experimental.pallas import tpu as pltpu


def make_mha_kernel(num_heads: int, head_dim: int, model_dim: int):
    D = model_dim
    H = num_heads
    hd = head_dim

    def kernel(x_ref, mask_ref, wqkv_ref, wo_ref, bo_ref, o_ref):
        # Per-batch-element tile: x_ref (1, S, D), mask (1, 1, S) f32 (1.0 = real key)
        x = x_ref[0]                                 # (S, D) f32
        mask = mask_ref[0]                           # (1, S) f32
        s_len = x.shape[0]

        # 1) fused QKV projection (no bias). Weight is pre-transposed (D, 3D) bf16,
        #    with 1/sqrt(hd) already folded into the Q columns.
        x16 = x.astype(jnp.bfloat16)
        qkv = jnp.dot(x16, wqkv_ref[...],
                      preferred_element_type=jnp.float32)          # (S, 3D) f32

        # 2) split heads: (S, D) -> (S, H, hd), bf16 for the MXU
        qh = qkv[:, 0 * D:1 * D].astype(jnp.bfloat16).reshape(s_len, H, hd)
        kh = qkv[:, 1 * D:2 * D].astype(jnp.bfloat16).reshape(s_len, H, hd)
        vh = qkv[:, 2 * D:3 * D].astype(jnp.bfloat16).reshape(s_len, H, hd)

        # 3) attention scores per head (scale already folded into Wq): (H, Sq, Sk) f32
        scores = jnp.einsum('qhd,khd->hqk', qh, kh,
                            preferred_element_type=jnp.float32)

        # additive mask + manual softmax (NaN-free, fully-masked rows -> exact 0)
        neg = (1.0 - mask) * (-1e30)                 # (1, Sk): 0 real / -1e30 padded
        s_masked = scores + neg[None, :, :]
        m = jnp.max(s_masked, axis=-1, keepdims=True)
        e = jnp.exp(s_masked - m) * mask[None, :, :]
        denom = jnp.sum(e, axis=-1, keepdims=True)
        inv = pl.reciprocal(jnp.maximum(denom, 1e-30), approx=True)
        probs = (e * inv).astype(jnp.bfloat16)       # (H, Sq, Sk)

        attn = jnp.einsum('hqk,khd->qhd', probs, vh,
                          preferred_element_type=jnp.float32)       # (Sq, H, hd) f32

        # 4) merge heads + output linear (with bias); Wo pre-transposed (D, D) bf16
        merged = attn.reshape(s_len, D).astype(jnp.bfloat16)
        out = jnp.dot(merged, wo_ref[...],
                      preferred_element_type=jnp.float32) + bo_ref[...]
        o_ref[0] = out.astype(o_ref.dtype)

    return kernel


def mha_block_pallas(q, kv_mask, params, num_heads: int):
    """q: (B, S, D) float32; kv_mask: (B, S) bool (True = real node)."""
    B, S, D = q.shape
    head_dim = D // num_heads
    scale = 1.0 / math.sqrt(head_dim)

    # Host-side weight packing: fused, pre-transposed, scale folded into Wq, bf16.
    w_qkv = jnp.concatenate(
        [params['wq'].T * scale, params['wk'].T, params['wv'].T],
        axis=1).astype(jnp.bfloat16)                  # (D, 3D)
    w_o = params['wo'].T.astype(jnp.bfloat16)         # (D, D)
    bo = params['bo'].reshape(1, D).astype(jnp.float32)
    mask_f = kv_mask.astype(jnp.float32).reshape(B, 1, S)

    kernel = make_mha_kernel(num_heads, head_dim, D)

    grid_spec = pltpu.PrefetchScalarGridSpec(
        num_scalar_prefetch=0,
        grid=(B,),
        in_specs=[
            pl.BlockSpec((1, S, D), lambda b: (b, 0, 0)),     # x (q == k == v)
            pl.BlockSpec((1, 1, S), lambda b: (b, 0, 0)),     # kv mask
            pl.BlockSpec((D, 3 * D), lambda b: (0, 0)),       # fused Wqkv (resident)
            pl.BlockSpec((D, D), lambda b: (0, 0)),           # Wo (resident)
            pl.BlockSpec((1, D), lambda b: (0, 0)),           # bo
        ],
        out_specs=pl.BlockSpec((1, S, D), lambda b: (b, 0, 0)),
    )

    # Advisory cost estimate for XLA's scheduler.
    flops = 2 * B * (4 * S * D * D + 2 * S * S * D)
    transcendentals = B * num_heads * S * S
    bytes_accessed = (2 * B * S * D * 4            # x in + out (f32)
                      + B * S * 4                  # mask
                      + (D * 3 * D + D * D) * 2    # bf16 weights
                      + D * 4)                     # bias
    cost = pl.CostEstimate(flops=flops, transcendentals=transcendentals,
                           bytes_accessed=bytes_accessed)

    # TODO(synk): for very large S on v7x (64 MiB VMEM) add an Sq grid axis with a
    # flash-style online-softmax Sk loop; whole-S-per-batch is fine for small/medium S.
    return pl.pallas_call(
        kernel,
        out_shape=jax.ShapeDtypeStruct((B, S, D), q.dtype),
        grid_spec=grid_spec,
        cost_estimate=cost,
        compiler_params=pltpu.CompilerParams(
            dimension_semantics=("parallel",),
            vmem_limit_bytes=64 * 1024 * 1024),
    )(q, mask_f, w_qkv, w_o, bo)


def mha_block_ref(q, kv_mask, params, num_heads: int):
    """Pure-JAX reference mirroring the PyTorch forward (k=v=q, eval mode)."""
    B, S, D = q.shape
    hd = D // num_heads
    qp = q @ params['wq'].T
    kp = q @ params['wk'].T
    vp = q @ params['wv'].T
    qh = qp.reshape(B, S, num_heads, hd).transpose(0, 2, 1, 3)
    kh = kp.reshape(B, S, num_heads, hd).transpose(0, 2, 1, 3)
    vh = vp.reshape(B, S, num_heads, hd).transpose(0, 2, 1, 3)
    scores = jnp.einsum('bhqd,bhkd->bhqk', qh, kh) / math.sqrt(hd)
    mask = kv_mask[:, None, None, :]                       # (B,1,1,Sk)
    scores = jnp.where(mask, scores, -jnp.inf)
    probs = jax.nn.softmax(scores, axis=-1)
    probs = jnp.where(jnp.isnan(probs), 0.0, probs)
    a = jnp.einsum('bhqk,bhkd->bhqd', probs, vh)
    a = a.transpose(0, 2, 1, 3).reshape(B, S, D)
    return a @ params['wo'].T + params['bo']


if __name__ == "__main__":
    B, S, D, H = 2, 8, 32, 4

    key = jax.random.PRNGKey(0)
    ks = jax.random.split(key, 6)
    bound = 1.0 / math.sqrt(D)   # PyTorch nn.Linear default init bound
    params = {
        'wq': jax.random.uniform(ks[0], (D, D), jnp.float32, -bound, bound),
        'wk': jax.random.uniform(ks[1], (D, D), jnp.float32, -bound, bound),
        'wv': jax.random.uniform(ks[2], (D, D), jnp.float32, -bound, bound),
        'wo': jax.random.uniform(ks[3], (D, D), jnp.float32, -bound, bound),
        'bo': jax.random.uniform(ks[4], (D,), jnp.float32, -bound, bound),
    }

    q = jax.random.normal(ks[5], (B, S, D), jnp.float32)
    # kv_mask: True = real node; pad out the last 2 keys of batch element 1
    kv_mask = jnp.ones((B, S), dtype=bool).at[1, -2:].set(False)

    out = mha_block_pallas(q, kv_mask, params, num_heads=H)
    out = jax.block_until_ready(out)

    ref = mha_block_ref(q, kv_mask, params, num_heads=H)
    assert out.shape == (B, S, D)
    # bf16 MXU inputs (f32 accumulation) + approx reciprocal -> loosened tolerance
    assert jnp.allclose(out, ref, atol=5e-2, rtol=5e-2), "mismatch vs reference"

    # TODO(synk): do_layer_norm / do_selfattn / init_zeros / attn_bias / q_mask variants
    # are not exercised (defaults in __init__ are False / None); semantics above match
    # the default config in eval mode (dropout_p = 0).
    print("KERNEL_OK")
</pallas_src>

<mosaic_0001>
module attributes {stable_mosaic.version = 11 : i64} {
  func.func @kernel(%arg0: i32, %arg1: memref<1x8x32xf32, #tpu.memory_space<vmem>>, %arg2: memref<1x1x8xf32, #tpu.memory_space<vmem>>, %arg3: memref<32x96xbf16, #tpu.memory_space<vmem>>, %arg4: memref<32x32xbf16, #tpu.memory_space<vmem>>, %arg5: memref<1x32xf32, #tpu.memory_space<vmem>>, %arg6: memref<1x8x32xf32, #tpu.memory_space<vmem>>) attributes {dimension_semantics = [#tpu.dimension_semantics<parallel>], iteration_bounds = array<i64: 2>, scalar_prefetch = 0 : i64, scratch_operands = 0 : i64, tpu.core_type = #tpu.core_type<tc>, window_params = [{transform_indices = @transform_0, window_bounds = array<i64: 1, 8, 32>}, {transform_indices = @transform_1, window_bounds = array<i64: 1, 1, 8>}, {pipeline_mode = #tpu.pipeline_mode<synchronous>, transform_indices = @transform_2, window_bounds = array<i64: 32, 96>}, {pipeline_mode = #tpu.pipeline_mode<synchronous>, transform_indices = @transform_3, window_bounds = array<i64: 32, 32>}, {pipeline_mode = #tpu.pipeline_mode<synchronous>, transform_indices = @transform_4, window_bounds = array<i64: 1, 32>}, {transform_indices = @transform_5, window_bounds = array<i64: 1, 8, 32>}]} {
    %c0 = arith.constant 0 : index
    %c0_0 = arith.constant 0 : index
    %c0_1 = arith.constant 0 : index
    %0 = vector.load %arg1[%c0, %c0_0, %c0_1] : memref<1x8x32xf32, #tpu.memory_space<vmem>>, vector<1x8x32xf32>
    %1 = vector.shape_cast %0 : vector<1x8x32xf32> to vector<8x32xf32>
    %c0_2 = arith.constant 0 : index
    %c0_3 = arith.constant 0 : index
    %c0_4 = arith.constant 0 : index
    %2 = vector.load %arg2[%c0_2, %c0_3, %c0_4] : memref<1x1x8xf32, #tpu.memory_space<vmem>>, vector<1x1x8xf32>
    %3 = vector.shape_cast %2 : vector<1x1x8xf32> to vector<1x8xf32>
    %4 = arith.truncf %1 : vector<8x32xf32> to vector<8x32xbf16>
    %c0_5 = arith.constant 0 : index
    %c0_6 = arith.constant 0 : index
    %5 = vector.load %arg3[%c0_5, %c0_6] : memref<32x96xbf16, #tpu.memory_space<vmem>>, vector<32x96xbf16>
    %cst = arith.constant dense<0.000000e+00> : vector<8x96xf32>
    %6 = tpu.matmul %4, %5, %cst {dimension_numbers = #tpu.dot_dimension_numbers<[1], [0], [0], [1], [0, 0, 1, 1], [], []>} : vector<8x32xbf16>, vector<32x96xbf16>, vector<8x96xf32> -> vector<8x96xf32>
    %7 = vector.extract_strided_slice %6 {offsets = [0, 0], sizes = [8, 32], strides = [1, 1]} : vector<8x96xf32> to vector<8x32xf32>
    %8 = arith.truncf %7 : vector<8x32xf32> to vector<8x32xbf16>
    %9 = vector.shape_cast %8 : vector<8x32xbf16> to vector<8x4x8xbf16>
    %10 = vector.extract_strided_slice %6 {offsets = [0, 32], sizes = [8, 32], strides = [1, 1]} : vector<8x96xf32> to vector<8x32xf32>
    %11 = arith.truncf %10 : vector<8x32xf32> to vector<8x32xbf16>
    %12 = vector.shape_cast %11 : vector<8x32xbf16> to vector<8x4x8xbf16>
    %13 = vector.extract_strided_slice %6 {offsets = [0, 64], sizes = [8, 32], strides = [1, 1]} : vector<8x96xf32> to vector<8x32xf32>
    %14 = arith.truncf %13 : vector<8x32xf32> to vector<8x32xbf16>
    %15 = vector.shape_cast %14 : vector<8x32xbf16> to vector<8x4x8xbf16>
    "tpu.trace_start"() <{level = 10 : i32, message = "qhd,khd->hqk"}> : () -> ()
    %cst_7 = arith.constant dense<0.000000e+00> : vector<4x8x8xf32>
    %16 = tpu.matmul %9, %12, %cst_7 {dimension_numbers = #tpu.dot_dimension_numbers<[2], [2], [0], [0], [0, 1, 0, 0, 1, 0], [1], [1]>} : vector<8x4x8xbf16>, vector<8x4x8xbf16>, vector<4x8x8xf32> -> vector<4x8x8xf32>
    "tpu.trace_stop"() : () -> ()
    %cst_8 = arith.constant 1.000000e+00 : f32
    %17 = vector.broadcast %cst_8 : f32 to vector<1x8xf32>
    %18 = arith.subf %17, %3 : vector<1x8xf32>
    %cst_9 = arith.constant -1.000000e+30 : f32
    %19 = vector.broadcast %cst_9 : f32 to vector<1x8xf32>
    %20 = arith.mulf %18, %19 : vector<1x8xf32>
    %21 = vector.shape_cast %20 : vector<1x8xf32> to vector<1x1x8xf32>
    %22 = vector.broadcast %21 : vector<1x1x8xf32> to vector<4x8x8xf32>
    %23 = arith.addf %16, %22 : vector<4x8x8xf32>
    %cst_10 = arith.constant dense<0xFF800000> : vector<4x8xf32>
    %24 = vector.multi_reduction <maximumf>, %23, %cst_10 [2] : vector<4x8x8xf32> to vector<4x8xf32>
    %25 = vector.shape_cast %24 : vector<4x8xf32> to vector<4x8x1xf32>
    %26 = vector.broadcast %25 : vector<4x8x1xf32> to vector<4x8x8xf32>
    %27 = arith.subf %23, %26 : vector<4x8x8xf32>
    %28 = math.exp %27 : vector<4x8x8xf32>
    %29 = vector.shape_cast %3 : vector<1x8xf32> to vector<1x1x8xf32>
    %30 = vector.broadcast %29 : vector<1x1x8xf32> to vector<4x8x8xf32>
    %31 = arith.mulf %28, %30 : vector<4x8x8xf32>
    %cst_11 = arith.constant dense<0.000000e+00> : vector<4x8xf32>
    %32 = vector.multi_reduction <add>, %31, %cst_11 [2] : vector<4x8x8xf32> to vector<4x8xf32>
    %33 = vector.shape_cast %32 : vector<4x8xf32> to vector<4x8x1xf32>
    %cst_12 = arith.constant 1.000000e-30 : f32
    %34 = vector.broadcast %cst_12 : f32 to vector<4x8x1xf32>
    %35 = arith.maximumf %33, %34 : vector<4x8x1xf32>
    %36 = tpu.reciprocal %35 {approx = true} : vector<4x8x1xf32> -> vector<4x8x1xf32>
    %37 = vector.broadcast %36 : vector<4x8x1xf32> to vector<4x8x8xf32>
    %38 = arith.mulf %31, %37 : vector<4x8x8xf32>
    %39 = arith.truncf %38 : vector<4x8x8xf32> to vector<4x8x8xbf16>
    "tpu.trace_start"() <{level = 10 : i32, message = "hqk,khd->qhd"}> : () -> ()
    %cst_13 = arith.constant dense<0.000000e+00> : vector<4x8x8xf32>
    %40 = tpu.matmul %15, %39, %cst_13 {dimension_numbers = #tpu.dot_dimension_numbers<[0], [2], [2], [1], [0, 1, 0, 2, 1, 1], [1], [0]>} : vector<8x4x8xbf16>, vector<4x8x8xbf16>, vector<4x8x8xf32> -> vector<4x8x8xf32>
    %41 = tpu.transpose %40, [2, 0, 1] : vector<4x8x8xf32> -> vector<8x4x8xf32>
    "tpu.trace_stop"() : () -> ()
    %42 = vector.shape_cast %41 : vector<8x4x8xf32> to vector<8x32xf32>
    %43 = arith.truncf %42 : vector<8x32xf32> to vector<8x32xbf16>
    %c0_14 = arith.constant 0 : index
    %c0_15 = arith.constant 0 : index
    %44 = vector.load %arg4[%c0_14, %c0_15] : memref<32x32xbf16, #tpu.memory_space<vmem>>, vector<32x32xbf16>
    %cst_16 = arith.constant dense<0.000000e+00> : vector<8x32xf32>
    %45 = tpu.matmul %43, %44, %cst_16 {dimension_numbers = #tpu.dot_dimension_numbers<[1], [0], [0], [1], [0, 0, 1, 1], [], []>} : vector<8x32xbf16>, vector<32x32xbf16>, vector<8x32xf32> -> vector<8x32xf32>
    %c0_17 = arith.constant 0 : index
    %c0_18 = arith.constant 0 : index
    %46 = vector.load %arg5[%c0_17, %c0_18] : memref<1x32xf32, #tpu.memory_space<vmem>>, vector<1x32xf32>
    %47 = vector.broadcast %46 : vector<1x32xf32> to vector<8x32xf32>
    %48 = arith.addf %45, %47 : vector<8x32xf32>
    %c0_19 = arith.constant 0 : index
    %c0_20 = arith.constant 0 : index
    %c0_21 = arith.constant 0 : index
    %49 = vector.load %arg6[%c0_19, %c0_20, %c0_21] : memref<1x8x32xf32, #tpu.memory_space<vmem>>, vector<1x8x32xf32>
    %50 = vector.shape_cast %49 : vector<1x8x32xf32> to vector<8x32xf32>
    %51 = vector.shape_cast %48 : vector<8x32xf32> to vector<1x8x32xf32>
    tpu.vector_store %arg6[%c0_19, %c0_20, %c0_21], %51 {strides = array<i32>} : memref<1x8x32xf32, #tpu.memory_space<vmem>>, vector<1x8x32xf32>,
    return
  }
  func.func @transform_0(%arg0: i32) -> (i32, i32, i32) {
    %c0_i32 = arith.constant 0 : i32
    %c0_i32_0 = arith.constant 0 : i32
    %c0_i32_1 = arith.constant 0 : i32
    return %arg0, %c0_i32, %c0_i32_0 : i32, i32, i32
  }
  func.func @transform_1(%arg0: i32) -> (i32, i32, i32) {
    %c0_i32 = arith.constant 0 : i32
    %c0_i32_0 = arith.constant 0 : i32
    %c0_i32_1 = arith.constant 0 : i32
    return %arg0, %c0_i32, %c0_i32_0 : i32, i32, i32
  }
  func.func @transform_2(%arg0: i32) -> (i32, i32) {
    %c0_i32 = arith.constant 0 : i32
    %c0_i32_0 = arith.constant 0 : i32
    %c0_i32_1 = arith.constant 0 : i32
    return %c0_i32, %c0_i32_0 : i32, i32
  }
  func.func @transform_3(%arg0: i32) -> (i32, i32) {
    %c0_i32 = arith.constant 0 : i32
    %c0_i32_0 = arith.constant 0 : i32
    %c0_i32_1 = arith.constant 0 : i32
    return %c0_i32, %c0_i32_0 : i32, i32
  }
  func.func @transform_4(%arg0: i32) -> (i32, i32) {
    %c0_i32 = arith.constant 0 : i32
    %c0_i32_0 = arith.constant 0 : i32
    %c0_i32_1 = arith.constant 0 : i32
    return %c0_i32, %c0_i32_0 : i32, i32
  }
  func.func @transform_5(%arg0: i32) -> (i32, i32, i32) {
    %c0_i32 = arith.constant 0 : i32
    %c0_i32_0 = arith.constant 0 : i32
    %c0_i32_1 = arith.constant 0 : i32
    return %arg0, %c0_i32, %c0_i32_0 : i32, i32, i32
  }
}

</mosaic_0001>

<bundles_post_ra>
// kernel: tpu_custom_call.1
= control target key start
LH: loop header
LB: loop body
LE: loop exit
PB: predicated region body
PF: predicated region fallthrough
CT: control target
= control target key end

     0   :  { %s1818_s0 = inlined_call_operand.hbm [shape: f32[2,8,32], index: 0, kind: input, shape index: {}]   ;;  %s1819_s1 = inlined_call_operand.hbm [shape: f32[2,1,8], index: 1, kind: input, shape index: {}]   ;;  %s1820_s2 = inlined_call_operand.hbm [shape: bf16[32,96], index: 2, kind: input, shape index: {}]   ;;  %s1821_s3 = inlined_call_operand.hbm [shape: bf16[32,32], index: 3, kind: input, shape index: {}]   ;;  %s1822_s4 = inlined_call_operand.vmem [shape: f32[1,32], index: 4, kind: input, shape index: {}]   ;;  %s1823_s5 = inlined_call_operand.hbm [shape: f32[2,8,32], index: 5, kind: output, shape index: {}]  }
   0x1   :  { %1824 = sst [smem:[#allocation17_spill]] %s1820_s2 }
   0x2   :  { %1825 = sst [smem:[#allocation18_spill]] %s1821_s3 }
   0x3   :  { %10 = vsyncpa [#allocation3], 0 }
   0x4   :  { %12 = vsyncpa [#allocation3 + $0x1], 0 }
   0x5   :  { %13 = vsyncpa [#allocation6], 0 }
   0x6   :  { %15 = vsyncpa [#allocation6 + $0x1], 0 }
   0x7   :  { %16 = vsyncpa [#allocation9], 0 }
   0x8   :  { %17 = vsyncpa [#allocation4], 0 }
   0x9   :  { %19 = vsyncpa [#allocation4 + $0x1], 0  ;;  %s1568_s18 = smov 0   ;;  %s1570_s19 = smov 0  }
   0xa   :  { %s1572_s20 = smov 0   ;;  %s1574_s21 = smov 0  }
   0xb LB: > { %s1826_s2 = sld [smem:[#allocation17_spill]]  ;;  %s1592_s25 = sadd.s32 4294967295, %s1522_s21   ;;  %s1522_s21 = sphi %s1574_s21, %s1840_s21   ;;  %s1518_s20 = sphi %s1572_s20, %s1839_s20   ;;  %s1514_s19 = sphi %s1570_s19, %s1838_s19   ;;  %s1510_s18 = sphi %s1568_s18, %s1837_s18  }
   0xc   : > { %p1152_p0 = scmp.ge.s32.totalorder %s1522_s21, 1  ;;  %p46_p1 = scmp.eq.s32.totalorder %s1592_s25, 0 }
   0xd   : > { %p171_p2 = scmp.lt.s32.totalorder %s1522_s21, 3  ;;  %s1524_s27 = smov [#allocation7]  }
   0xe   : > { %s184_s28 = sshll.u32 %s1524_s27, 4  ;;  %s1828_s3 = sld [smem:[#allocation18_spill]]  ;;  %s185_s28 = int_to_ptr.vmem [resolvable:$true] %s184_s28 }
   0xf   : > { %p1597_p3 = pnand %p1152_p0, %p171_p2  ;;  %s1525_s7 = smov [#allocation8]  }
  0x10   : > { %s198_s8 = sshll.u32 %s1525_s7, 4  ;;  %s1526_s9 = smov 64   ;;  %s199_s8 = int_to_ptr.vmem [resolvable:$true] %s198_s8 }
  0x11   : > { %s182_s24 = sshll.u32 %s1826_s2, 4  ;;  %p1211_p4 = pneg %p1597_p3  ;;  %s183_s24 = int_to_ptr.hbm [resolvable:$true] %s182_s24 }
  0x12   : > { %s1527_s10 = smov 4   ;;  %s1151_s11 = sadd.s32 4294967294, %s1522_s21  }
  0x13   : > { %p1212_p6 = pnand %p1211_p4, %p46_p1  ;;  %s1611_s12 = sadd.s32 1, %s1522_s21  }
  0x14   : > { %s196_s6 = sshll.u32 %s1828_s3, 4  ;;  %s29_s13 = ssub.s32 %s1522_s21, %s1611_s12  ;;  %s197_s6 = int_to_ptr.hbm [resolvable:$true] %s196_s6 }
  0x15   : > { %1214 = dma.hbm_to_vmem [thread:$0]  (!%p1212_p6), %s183_s24, 256, %s185_s28, [#allocation6], %s1526_s9, %s1526_s9, %s1527_s10  }
  0x16   : > { %1217 = dma.hbm_to_vmem [thread:$0]  (!%p1212_p6), %s197_s6, 256, %s199_s8, [#allocation9], %s1526_s9, %s1526_s9, %s1527_s10  }
  0x17   : > { %s32_s14 = sadd.s32 1, %s1518_s20  ;;  %p30_p7 = scmp.eq.s32.totalorder %s29_s13, 0 }
  0x18   : > { %p39_p8 = scmp.ne.s32.totalorder %s1518_s20, %s1514_s19  ;;  %p40_p9 = scmp.eq.s32.totalorder %s1522_s21, 0 }
  0x19   : > { %p45_p10 = scmp.ne.s32.totalorder %s1514_s19, %s1510_s18  ;;  %p158_p13 = scmp.eq.s32.totalorder %s1592_s25, 1 }
  0x1a   : > { %s1622_s15 = scalar_select %p30_p7, %s1518_s20, %s32_s14  }
  0x1b   : > { %p1624_p11 = por %p40_p9, %p39_p8  ;;  %p1630_p12 = por %p46_p1, %p45_p10 }
  0x1c   : > { %1829 = sst [smem:[#allocation16_spill]] %s1622_s15  ;;  %p164_p0 = scmp.eq.s32.totalorder %s1151_s11, 1 }
  0x1d   : > { %p1231_p2 = scmp.lt.s32.totalorder %s1522_s21, 2  ;;  %s1637_s22 = sand.u32 1, %s1518_s20  }
  0x1e   : > { %p1639_p4 = por %p158_p13, %p39_p8  ;;  %p1643_p6 = por %p164_p0, %p45_p10 }
  0x1f   : > { %s1156_s27 = sshll.u32 %s1637_s22, 3  ;;  %s1157_s28 = sshll.u32 %s1522_s21, 3 }
  0x20   : > { %s223_s6 = scalar_lea.hbm %s1818_s0, %s1157_s28  ;;  %s219_s7 = scalar_lea.vmem [#allocation2], %s1156_s27 }
  0x21   : > { %s227_s8 = sshll.u32 %s219_s7, 4  ;;  %s225_s9 = sshll.u32 %s223_s6, 4  ;;  %s228_s8 = int_to_ptr.vmem [resolvable:$true] %s227_s8  ;;  %s226_s9 = int_to_ptr.hbm [resolvable:$true] %s225_s9 }
  0x22   : > { %p1654_p7 = pnand %p1231_p2, %p1624_p11  ;;  %s234_s11 = sand.u32 1, %s1522_s21  }
  0x23   : > { %s216_s13 = scalar_lea.sflag [#allocation3], %s1637_s22  ;;  %s1384_s14 = sshra.s32 %s226_s9, 4  ;;  %s1385_s14 = int_to_ptr.hbm [resolvable:$true] %s1384_s14 }
  0x24   : > { %s1386_s2 = scalar_lea.hbm %s1385_s14, 8  ;;  %p1388_p9 = pneg %p1654_p7 }
  0x25   : > { %p1387_p8 = scmp.ne.s32.totalorder %s1385_s14, %s1386_s2  ;;  %s1391_s28 = scalar_lea.hbm %s1818_s0, 16 }
  0x26   : > { %p1392_p11 = scmp.lt.s32.totalorder %s1385_s14, %s1818_s0  ;;  %p1393_p0 = scmp.lt.s32.totalorder %s1391_s28, %s1386_s2 }
  0x27   : > { %p1389_p10 = pnand %p1388_p9, %p1387_p8 }
  0x28   : > { %p1394_p2 = por %p1393_p0, %p1392_p11 }
  0x29   : > { %p1390_p13 = pneg %p1389_p10 }
  0x2b   : > { %p1395_p5 = pnand %p1394_p2, %p1390_p13 }
  0x2d   : > { %1398 = shalt.err (!%p1395_p5)
}
  0x2e   : > { %1221 = dma.hbm_to_vmem [thread:$0]  (!%p1654_p7), %s226_s9, 128, %s228_s8, %s216_s13  }
  0x2f   : > { %s240_s3 = scalar_lea.hbm %s1819_s1, %s1522_s21  ;;  %s237_s27 = scalar_lea.vmem [#allocation5], %s1637_s22 }
  0x30   : > { %s244_s16 = sshll.u32 %s237_s27, 4  ;;  %s242_s15 = sshll.u32 %s240_s3, 4  ;;  %s245_s16 = int_to_ptr.vmem [resolvable:$true] %s244_s16  ;;  %s243_s15 = int_to_ptr.hbm [resolvable:$true] %s242_s15 }
  0x31   : > { %s235_s14 = scalar_lea.sflag [#allocation6], %s234_s11  ;;  %s1414_s2 = sshra.s32 %s243_s15, 4  ;;  %s1415_s2 = int_to_ptr.hbm [resolvable:$true] %s1414_s2 }
  0x32   : > { %s1416_s28 = scalar_lea.hbm %s1415_s2, 1  ;;  %s1421_s9 = scalar_lea.hbm %s1819_s1, 2 }
  0x33   : > { %p1417_p5 = scmp.ne.s32.totalorder %s1415_s2, %s1416_s28  ;;  %p1422_p13 = scmp.lt.s32.totalorder %s1415_s2, %s1819_s1 }
  0x34   : > { %p1423_p11 = scmp.lt.s32.totalorder %s1421_s9, %s1416_s28 }
  0x35   : > { %p1419_p8 = pnand %p1417_p5, %p1388_p9 }
  0x36   : > { %p1424_p0 = por %p1423_p11, %p1422_p13 }
  0x37   : > { %p1420_p10 = pneg %p1419_p8 }
  0x39   : > { %p1425_p2 = pnand %p1424_p0, %p1420_p10 }
  0x3b   : > { %1428 = shalt.err (!%p1425_p2)
}
  0x3c   : > { %1224 = dma.hbm_to_vmem [thread:$0]  (!%p1654_p7), %s243_s15, 16, %s245_s16, %s235_s14  }
  0x3d   : > { %253 = sbr.rel (%p1597_p3) target bundleno = 1731 (0x6c3), region = 40  ;;  %s1692_s3 = sand.u32 (!%p1597_p3), 1, %s1514_s19  }
  0x3e   : > { %s1159_s22 = sshll.u32 (!%p1597_p3), %s1692_s3, 3  ;;  %s256_s11 = scalar_lea.sflag (!%p1597_p3), [#allocation3], %s1692_s3 }
  0x3f   : > { %s259_s6 = scalar_lea.vmem (!%p1597_p3), [#allocation2], %s1159_s22 }
  0x42   : > { %1489 = dma.done.wait (%p1630_p12), %s256_s11, 128  }
  0x43   : > { %1491 = vsyncadd (%p1630_p12), %s256_s11, 4294967168  ;;  %s265_s26 = sand.u32 1, %s1592_s25   ;;  %s268_s10 = scalar_lea.vmem [#allocation5], %s1692_s3 }
  0x44   : > { %s266_s15 = scalar_lea.sflag [#allocation6], %s265_s26 }
  0x45   : > { %1493 = dma.done.wait (%p1630_p12), %s266_s15, 16  }
  0x46   : > { %1495 = vsyncadd (%p1630_p12), %s266_s15, 4294967280 }
  0x47   : > { %1497 = dma.done.wait (%p46_p1), [#allocation6], 256  }
  0x48   : > { %1499 = vsyncadd (%p46_p1), [#allocation6], 4294967040 }
  0x49   : > { %1501 = dma.done.wait (%p46_p1), [#allocation9], 256  }
  0x4a   : > { %1503 = vsyncadd (%p46_p1), [#allocation9], 4294967040  ;;  %v1194_v0 = vld [vmem:[#allocation7 + $0x8] sm:$0xff]  ;;  %v1193_v1 = vld [vmem:[#allocation7] sm:$0xff]  ;;  %vm330_vm0 = vcmask 261120   ;;  %s1528_s17 = smov 104  }
  0x4b   : > { %340 = vmatpush.bf16.msra.mxu0 %v1194_v0  ;;  %v311_v2 = vld [vmem:[%s259_s6] sm:$0xff]  ;;  %s1529_s7 = smov 120   ;;  %s1530_s27 = smov 112   ;;  %vm448_vm1 = vcmask 1043456   ;;  %vm444_vm2 = vcmask 64512   ;;  %vm862_vm3 = vcmask 1047556  }
  0x4c   : > { %v313_v3 = vpack.c.bf16 %v311_v2, %v311_v2  ;;  %s1531_s16 = smov 96   ;;  %v312_v30 = vld [vmem:[%s268_s10] sm:$0x1]  ;;  %s1532_s14 = smov 64   ;;  %vm985_vm4 = vcmask 130048   ;;  %vm987_vm5 = vcmask 195584  }
  0x4d   : > { %v355_v31 = vsub.f32 1.0, %v312_v30  ;;  %v1306_v53 = vld [vmem:[%s268_s10] ss:$0 sm:$0xff]  ;;  %s1535_s2 = smov 24   ;;  %s1536_s28 = smov 16  }
  0x4e   : > { %s1537_s29 = smov 8   ;;  %s1190_s8 = sshll.u32 %s1592_s25, 3 }
  0x4f   : > { %341 = vmatpush.bf16.msra.mxu0 %v1193_v1  ;;  %v356_v32 = vmul.f32 -1e+30, %v355_v31  ;;  %s1038_s30 = scalar_lea.hbm %s1823_s5, %s1190_s8  ;;  %s309_s26 = scalar_lea.vmem [#allocation10], %s1159_s22 }
  0x50   : > { %s1040_s15 = sshll.u32 %s309_s26, 4  ;;  %s1042_s10 = sshll.u32 %s1038_s30, 4  ;;  %s1041_s15 = int_to_ptr.vmem [resolvable:$true] %s1040_s15  ;;  %s1043_s10 = int_to_ptr.hbm [resolvable:$true] %s1042_s10 }
  0x51   : > { %v358_v33 = vperm.slane %v356_v32, 0  ;;  %s1028_s25 = scalar_lea.sflag [#allocation4], %s1692_s3  ;;  %s1464_s22 = scalar_lea.hbm %s1823_s5, 16 }
  0x52   : > { %1171 = vmatmul.msk.bf16.vlgmr.msra.gmra.mxu0 %vm330_vm0, %v313_v3 }
  0xcf   : > { %v343_v4 = vpop.f32.mrf.mxu0 }
  0xd0   : > { %v347_v5 = vpack.c.bf16 %v343_v4, %v343_v4 }
  0xd2   : > { %353 = vrot.lane.b32.xlu1 %v347_v5, %s1528_s17  ;;  %349 = vrot.lane.b32.xlu0 %v347_v5, %s1529_s7  ;;  %v360_v6 = vunpack.c.l.b16 %v347_v5  ;;  %s1458_s17 = sshra.s32 %s1043_s10, 4  ;;  %s1459_s17 = int_to_ptr.hbm [resolvable:$true] %s1458_s17 }
  0xd3   : > { %s1460_s7 = scalar_lea.hbm %s1459_s17, 8  ;;  %p1465_p7 = scmp.lt.s32.totalorder %s1459_s17, %s1823_s5 }
  0xd4   : > { %v1717_v8 = vpack.c.b16 %v360_v6, %v360_v6  ;;  %p1461_p1 = scmp.ne.s32.totalorder %s1459_s17, %s1460_s7  ;;  %p1466_p9 = scmp.lt.s32.totalorder %s1464_s22, %s1460_s7 }
  0xd6   : > { %p1462_p3 = pnand %p1461_p1, %p1639_p4  ;;  %p1467_p5 = por %p1466_p9, %p1465_p7 }
  0xd7   : > { %v345_v7 = vpop.f32.mrf.mxu0 }
  0xd8   : > { %p1463_p12 = pneg %p1462_p3 }
  0xda   : > { %351 = vrot.lane.b32.xlu0 %v347_v5, %s1530_s27  ;;  %368 = vrot.lane.b32.xlu1 %v1717_v8, %s1531_s16  ;;  %p1468_p8 = pnand %p1467_p5, %p1463_p12 }
 0x144   : > { %v354_v9 = vpop.permute.xlu1 %353  ;;  %v350_v10 = vpop.permute.xlu0 %349 }
 0x145   : > { %v363_v11 = vunpack.c.l.b16 %v354_v9  ;;  %v361_v12 = vunpack.c.l.b16 %v350_v10 }
 0x147   : > { %v1720_v13 = vpack.c.b16 %v363_v11, %v363_v11  ;;  %v365_v14 = vpack.c.b16 %v361_v12, %v361_v12 }
 0x149   : > { %374 = vrot.lane.b32.xlu0 %v1720_v13, %s1531_s16  ;;  %370 = vrot.lane.b32.xlu2 %v365_v14, %s1531_s16 }
 0x14c   : > { %v352_v15 = vpop.permute.xlu0 %351  ;;  %v369_v18 = vpop.permute.xlu1 %368 }
 0x14d   : > { %v362_v16 = vunpack.c.l.b16 %v352_v15 }
 0x14f   : > { %v366_v17 = vpack.c.b16 %v362_v16, %v362_v16 }
 0x151   : > { %372 = vrot.lane.b32.xlu2 %v366_v17, %s1531_s16 }
 0x1a3   : > { %v371_v19 = vpop.permute.xlu2 %370 }
 0x1a4   : > { %1283 = vxpose.binary.xlu1.c.b16.start.end [1/2] (short) (narrow) %v371_v19, %v369_v18, 16 }
 0x1ab   : > { %v373_v20 = vpop.permute.xlu2 %372 }
 0x1ac   : > { %412 = vxpose.xlu2.c.b16.start.end [1/1] (short) (narrow) %v373_v20, 16 }
 0x1bb   : > { %v375_v21 = vpop.permute.xlu0 %374 }
 0x1bc   : > { %428 = vxpose.xlu0.c.b16.start.end [1/1] (short) (narrow) %v375_v21, 16 }
 0x24d   : > { %v420_v22 = vpop.trf.xlu2 }
 0x24e   : > { %v488_v23 = vsel %vm448_vm1, %v420_v22, 0 }
 0x24f   : > { %497 = vmatpush.bf16.msra.mxu3 %v488_v23 }
 0x250   : > { %v1284_v24 = vpop.trf.xlu1 }
 0x251   : > { %v450_v25 = vsel %vm448_vm1, %v1284_v24, 0 }
 0x252   : > { %459 = vmatpush.bf16.msra.mxu1 %v450_v25  ;;  %1174 = vmatmul.msk.bf16.vlgmr.msra.gmra.mxu3 %vm444_vm2, %v352_v15 }
 0x255   : > { %1172 = vmatmul.msk.bf16.vlgmr.msra.gmra.mxu1 %vm444_vm2, %v347_v5 }
 0x258   : > { %v1285_v26 = vpop.trf.xlu1 }
 0x259   : > { %v469_v27 = vsel %vm448_vm1, %v1285_v26, 0 }
 0x25a   : > { %478 = vmatpush.bf16.msra.mxu2 %v469_v27 }
 0x25d   : > { %1173 = vmatmul.msk.bf16.vlgmr.msra.gmra.mxu2 %vm444_vm2, %v350_v10 }
 0x268   : > { %v436_v28 = vpop.trf.xlu0 }
 0x269   : > { %v507_v29 = vsel %vm448_vm1, %v436_v28, 0 }
 0x26a   : > { %516 = vmatpush.bf16.msrb.mxu1 %v507_v29 }
 0x26d   : > { %1175 = vmatmul.msk.bf16.vlgmr.msrb.gmra.mxu1 %vm444_vm2, %v354_v9 }
 0x2d2   : > { %v461_v34 = vpop.f32.mrf.mxu1 }
 0x2d3   : > { %v462_v35 = vadd.f32 %v461_v34, %v358_v33 }
 0x2d5   : > { %v499_v36 = vpop.f32.mrf.mxu3  ;;  %v522_v37 = vsel %vm444_vm2, %v462_v35, -inf }
 0x2d6   : > { %523 = vmax.xlane.f32.xlu2 %v522_v37  ;;  %v500_v47 = vadd.f32 %v499_v36, %v358_v33 }
 0x2d8   : > { %v528_v49 = vsel %vm444_vm2, %v500_v47, -inf }
 0x2da   : > { %v463_v38 = vpop.f32.mrf.mxu1 }
 0x2dd   : > { %v501_v39 = vpop.f32.mrf.mxu3 }
 0x2e0   : > { %v480_v40 = vpop.f32.mrf.mxu2 }
 0x2e1   : > { %v481_v41 = vadd.f32 %v480_v40, %v358_v33 }
 0x2e3   : > { %v525_v42 = vsel %vm444_vm2, %v481_v41, -inf }
 0x2e4   : > { %526 = vmax.xlane.f32.xlu0 %v525_v42 }
 0x2e8   : > { %v482_v43 = vpop.f32.mrf.mxu2 }
 0x2ea   : > { %v518_v44 = vpop.f32.mrf.mxu1 }
 0x2eb   : > { %v519_v45 = vadd.f32 %v518_v44, %v358_v33 }
 0x2ed   : > { %v531_v46 = vsel %vm444_vm2, %v519_v45, -inf }
 0x2ee   : > { %532 = vmax.xlane.f32.xlu1 %v531_v46  ;;  %583 = vrot.lane.b32.xlu2 %v365_v14, %s1532_s14 }
 0x2f2   : > { %v520_v48 = vpop.f32.mrf.mxu1 }
 0x2f6   : > { %529 = vmax.xlane.f32.xlu1 %v528_v49 }
 0x2f8   : > { %581 = vrot.lane.b32.xlu0 %v1717_v8, %s1532_s14 }
 0x30f   : > { %585 = vrot.lane.b32.xlu1 %v366_v17, %s1532_s14 }
 0x349   : > { %v524_v50 = vpop.xlane.xlu2 %523 }
 0x34a   : > { %v534_v51 = vsub.f32 %v462_v35, %v524_v50 }
 0x34c   : > { %v538_v52 = vmul.f32 1.442695, %v534_v51 }
 0x34e   : > { %1308 = vpow2.f32 %v538_v52 }
 0x351   : > { %v584_v11 = vpop.permute.xlu2 %583 }
 0x354   : > { %v1309_v54 = vpop.eup %1308 }
 0x355   : > { %v549_v55 = vmul.f32 %v1309_v54, %v1306_v53 }
 0x357   : > { %v527_v56 = vpop.xlane.xlu0 %526  ;;  %v553_v57 = vsel %vm444_vm2, %v549_v55, 0.0 }
 0x358   : > { %v535_v58 = vsub.f32 %v481_v41, %v527_v56  ;;  %554 = vadd.xlane.f32.xlu2 %v553_v57 }
 0x35a   : > { %v540_v59 = vmul.f32 1.442695, %v535_v58 }
 0x35c   : > { %1310 = vpow2.f32 %v540_v59 }
 0x361   : > { %v533_v60 = vpop.xlane.xlu1 %532 }
 0x362   : > { %v1311_v61 = vpop.eup %1310  ;;  %v537_v62 = vsub.f32 %v519_v45, %v533_v60 }
 0x363   : > { %v550_v63 = vmul.f32 %v1311_v61, %v1306_v53  ;;  %v1534_v61 = vmov 1934713408  }
 0x364   : > { %v544_v0 = vmul.f32 1.442695, %v537_v62  ;;  %v891_v62 = vunpack.c.l.s4 %v1534_v61 }
 0x365   : > { %v556_v1 = vsel %vm444_vm2, %v550_v63, 0.0 }
 0x366   : > { %1312 = vpow2.f32 %v544_v0  ;;  %557 = vadd.xlane.f32.xlu1 %v556_v1 }
 0x369   : > { %v530_v2 = vpop.xlane.xlu1 %529 }
 0x36a   : > { %v536_v3 = vsub.f32 %v500_v47, %v530_v2  ;;  %v582_v12 = vpop.permute.xlu0 %581 }
 0x36c   : > { %v1313_v4 = vpop.eup %1312  ;;  %v542_v5 = vmul.f32 1.442695, %v536_v3 }
 0x36d   : > { %v552_v6 = vmul.f32 %v1313_v4, %v1306_v53 }
 0x36e   : > { %1314 = vpow2.f32 %v542_v5 }
 0x36f   : > { %v562_v7 = vsel %vm444_vm2, %v552_v6, 0.0 }
 0x370   : > { %587 = vrot.lane.b32.xlu2 %v1720_v13, %s1532_s14  ;;  %563 = vadd.xlane.f32.xlu0 %v562_v7 }
 0x374   : > { %v1315_v8 = vpop.eup %1314 }
 0x375   : > { %v551_v9 = vmul.f32 %v1315_v8, %v1306_v53  ;;  %v1533_v53 = vmov 1983009808   ;;  %v892_v8 = vunpack.c.0.s8 %v891_v62 }
 0x376   : > { %v867_v54 = vunpack.c.l.s4 %v1533_v53 }
 0x377   : > { %v559_v10 = vsel %vm444_vm2, %v551_v9, 0.0 }
 0x378   : > { %560 = vadd.xlane.f32.xlu1 %v559_v10  ;;  %v868_v58 = vunpack.c.0.s8 %v867_v54 }
 0x381   : > { %v586_v16 = vpop.permute.xlu1 %585 }
 0x396   : > { %1286 = vxpose.binary.xlu2.c.b16.start.end [1/2] (short) (narrow) %v584_v11, %v582_v12, 16 }
 0x3cb   : > { %v555_v14 = vpop.xlane.xlu2 %554 }
 0x3cc   : > { %v565_v15 = vmax.f32 %v555_v14, 1e-30 }
 0x3ce   : > { %1316 = vrcp.f32 %v565_v15 }
 0x3d3   : > { %v588_v17 = vpop.permute.xlu2 %587 }
 0x3d4   : > { %v1317_v18 = vpop.eup %1316  ;;  %1289 = vxpose.binary.xlu1.c.b16.start.end [1/2] (short) (narrow) %v588_v17, %v586_v16, 16 }
 0x3d5   : > { %v573_v19 = vmul.f32 %v1317_v18, %v549_v55 }
 0x3d7   : > { %v577_v20 = vpack.c.bf16 %v573_v19, %v573_v19 }
 0x3d9   : > { %v558_v21 = vpop.xlane.xlu1 %557  ;;  %v661_v13 = vsel %vm444_vm2, %v577_v20, 0 }
 0x3da   : > { %v566_v22 = vmax.f32 %v558_v21, 1e-30  ;;  %670 = vmatpush.bf16.xpose.msrb.mxu2 %v661_v13 }
 0x3dc   : > { %1318 = vrcp.f32 %v566_v22 }
 0x3e2   : > { %v1319_v23 = vpop.eup %1318 }
 0x3e3   : > { %v564_v24 = vpop.xlane.xlu0 %563  ;;  %v574_v25 = vmul.f32 %v1319_v23, %v550_v63 }
 0x3e4   : > { %v568_v26 = vmax.f32 %v564_v24, 1e-30 }
 0x3e5   : > { %v578_v27 = vpack.c.bf16 %v574_v25, %v574_v25 }
 0x3e6   : > { %1320 = vrcp.f32 %v568_v26 }
 0x3e7   : > { %v680_v28 = vsel %vm444_vm2, %v578_v27, 0 }
 0x3e8   : > { %689 = vmatpush.bf16.xpose.msrb.mxu3 %v680_v28 }
 0x3eb   : > { %v561_v29 = vpop.xlane.xlu1 %560 }
 0x3ec   : > { %v1321_v30 = vpop.eup %1320  ;;  %v567_v31 = vmax.f32 %v561_v29, 1e-30 }
 0x3ed   : > { %v576_v32 = vmul.f32 %v1321_v30, %v552_v6 }
 0x3ee   : > { %1322 = vrcp.f32 %v567_v31 }
 0x3ef   : > { %v580_v33 = vpack.c.bf16 %v576_v32, %v576_v32 }
 0x3f1   : > { %v718_v34 = vsel %vm444_vm2, %v580_v33, 0 }
 0x3f2   : > { %727 = vmatpush.bf16.xpose.msra.mxu1 %v718_v34 }
 0x3f4   : > { %v1323_v35 = vpop.eup %1322 }
 0x3f5   : > { %v575_v36 = vmul.f32 %v1323_v35, %v551_v9 }
 0x3f7   : > { %v579_v37 = vpack.c.bf16 %v575_v36, %v575_v36 }
 0x3f9   : > { %v699_v38 = vsel %vm444_vm2, %v579_v37, 0 }
 0x3fa   : > { %708 = vmatpush.bf16.xpose.msrb.mxu0 %v699_v38 }
 0x437   : > { %v1287_v39 = vpop.trf.xlu2 }
 0x438   : > { %1176 = vmatmul.msk.bf16.vlgmr.msrb.gmra.mxu2 %vm444_vm2, %v1287_v39 }
 0x43f   : > { %v1288_v40 = vpop.trf.xlu2 }
 0x440   : > { %1177 = vmatmul.msk.bf16.vlgmr.msrb.gmra.mxu3 %vm444_vm2, %v1288_v40 }
 0x480   : > { %v1290_v41 = vpop.trf.xlu1 }
 0x481   : > { %1178 = vmatmul.msk.bf16.vlgmr.msrb.gmra.mxu0 %vm444_vm2, %v1290_v41 }
 0x488   : > { %v1291_v42 = vpop.trf.xlu1 }
 0x489   : > { %1179 = vmatmul.msk.bf16.vlgmr.msra.gmra.mxu1 %vm444_vm2, %v1291_v42 }
 0x4bb   : > { %v672_v43 = vpop.f32.mrf.mxu2 }
 0x4c3   : > { %v674_v44 = vpop.f32.mrf.mxu2  ;;  %v691_v45 = vpop.f32.mrf.mxu3 }
 0x4cb   : > { %v693_v46 = vpop.f32.mrf.mxu3 }
 0x4fe   : > { %v710_v47 = vpop.f32.mrf.mxu0 }
 0x4ff   : > { %v1292_v48 = vpack.i.bf16 %v672_v43, %v710_v47 }
 0x501   : > { %1293 = vxpose.xlu0.b32.start.end [1/1] (short) (narrow) %v1292_v48, 8 }
 0x506   : > { %v712_v49 = vpop.f32.mrf.mxu0  ;;  %v729_v50 = vpop.f32.mrf.mxu1 }
 0x507   : > { %v1299_v51 = vpack.i.bf16 %v691_v45, %v729_v50 }
 0x509   : > { %1300 = vxpose.xlu2.b32.start.end [1/1] (short) (narrow) %v1299_v51, 8 }
 0x50e   : > { %v731_v52 = vpop.f32.mrf.mxu1 }
 0x5a2   : > { %v1301_v55 = vpop.trf.xlu2 }
 0x5a3   : > { %v1305_v56 = vunpack.i.h.bf16 %v1301_v55  ;;  %v1302_v57 = vunpack.i.l.bf16 %v1301_v55 }
 0x5a5   : > { %v876_v59 = vrot.slane %v1305_v56, 4  ;;  %v874_v60 = vrot.slane %v1302_v57, 4  ;;  %v1294_v63 = vpop.trf.xlu0 }
 0x5a6   : > { %v1298_v0 = vunpack.i.h.bf16 %v1294_v63  ;;  %v1295_v1 = vunpack.i.l.bf16 %v1294_v63  ;;  %v1196_v63 = vld [vmem:[#allocation8 + $0x8] sm:$0xff] }
 0x5a7   : > { %v875_v2 = vsel %vm862_vm3, %v874_v60, %v1305_v56  ;;  %v877_v3 = vsel %vm862_vm3, %v1302_v57, %v876_v59  ;;  %1019 = vmatpush.bf16.msra.mxu2 %v1196_v63 }
 0x5a8   : > { %v881_v4 = vperm.slane %v875_v2, %v868_v58  ;;  %v885_v5 = vperm.slane %v877_v3, %v868_v58  ;;  %v864_v6 = vrot.slane %v1298_v0, 4  ;;  %v861_v7 = vrot.slane %v1295_v1, 4 }
 0x5aa   : > { %v886_v9 = vrot.slane %v881_v4, 4  ;;  %v898_v10 = vrot.slane %v885_v5, 4  ;;  %v863_v11 = vsel %vm862_vm3, %v861_v7, %v1298_v0  ;;  %v865_v12 = vsel %vm862_vm3, %v1295_v1, %v864_v6  ;;  %v1195_v0 = vld [vmem:[#allocation8] sm:$0xff] }
 0x5ab   : > { %v869_v14 = vperm.slane %v863_v11, %v868_v58  ;;  %v873_v15 = vperm.slane %v865_v12, %v868_v58  ;;  %1020 = vmatpush.bf16.msra.mxu2 %v1195_v0 }
 0x5ad   : > { %v887_v16 = vsel %vm862_vm3, %v886_v9, %v869_v14  ;;  %v888_v17 = vrot.slane %v869_v14, 4  ;;  %v899_v18 = vsel %vm862_vm3, %v898_v10, %v873_v15  ;;  %v900_v19 = vrot.slane %v873_v15, 4 }
 0x5ae   : > { %v893_v20 = vperm.slane %v887_v16, %v892_v8  ;;  %v905_v21 = vperm.slane %v899_v18, %v892_v8 }
 0x5af   : > { %v889_v13 = vsel %vm862_vm3, %v881_v4, %v888_v17  ;;  %v901_v22 = vsel %vm862_vm3, %v885_v5, %v900_v19 }
 0x5b0   : > { %v897_v23 = vperm.slane %v889_v13, %v892_v8  ;;  %v909_v24 = vperm.slane %v901_v22, %v892_v8  ;;  %v910_v25 = vrot.slane %v893_v20, 4  ;;  %v914_v27 = vrot.slane %v905_v21, 4 }
 0x5b2   : > { %v912_v26 = vrot.slane %v897_v23, 4  ;;  %v916_v28 = vrot.slane %v909_v24, 4  ;;  %v911_v37 = vsel %vm862_vm3, 0.0, %v910_v25  ;;  %v915_v38 = vsel %vm862_vm3, 0.0, %v914_v27 }
 0x5b4   : > { %v913_v29 = vsel %vm862_vm3, 0.0, %v912_v26  ;;  %v917_v30 = vsel %vm862_vm3, 0.0, %v916_v28  ;;  %v918_v31 = vsel %vm862_vm3, %v912_v26, %v893_v20  ;;  %v929_v32 = vsel %vm862_vm3, %v916_v28, %v905_v21 }
 0x5b5   : > { %v922_v33 = vperm.slane %v918_v31, %v868_v58  ;;  %v923_v34 = vrot.slane %v913_v29, 4  ;;  %v933_v35 = vperm.slane %v929_v32, %v868_v58  ;;  %v934_v36 = vrot.slane %v917_v30, 4 }
 0x5b7   : > { %v924_v39 = vsel %vm862_vm3, %v923_v34, %v911_v37  ;;  %v935_v40 = vsel %vm862_vm3, %v934_v36, %v915_v38  ;;  %v942_v41 = vrot.slane %v922_v33, 4  ;;  %v954_v42 = vrot.slane %v933_v35, 4 }
 0x5b8   : > { %v928_v43 = vperm.slane %v924_v39, %v868_v58  ;;  %v939_v44 = vperm.slane %v935_v40, %v868_v58 }
 0x5ba   : > { %v943_v45 = vsel %vm862_vm3, %v928_v43, %v942_v41  ;;  %v955_v46 = vsel %vm862_vm3, %v939_v44, %v954_v42  ;;  %v940_v47 = vrot.slane %v928_v43, 4  ;;  %v952_v48 = vrot.slane %v939_v44, 4 }
 0x5bb   : > { %v951_v49 = vperm.slane %v943_v45, %v892_v8  ;;  %v963_v50 = vperm.slane %v955_v46, %v892_v8 }
 0x5bc   : > { %v941_v51 = vsel %vm862_vm3, %v940_v47, %v922_v33  ;;  %v953_v52 = vsel %vm862_vm3, %v952_v48, %v933_v35 }
 0x5bd   : > { %v970_v53 = vrot.slane %v951_v49, 4  ;;  %v968_v54 = vrot.slane %v963_v50, 4  ;;  %v947_v55 = vperm.slane %v941_v51, %v892_v8  ;;  %v959_v56 = vperm.slane %v953_v52, %v892_v8  ;;  %v1307_v8 = vld [vmem:[%s1822_s4] ss:$0 sm:$0xff] }
 0x5bf   : > { %v971_v57 = vsel %vm862_vm3, %v963_v50, %v970_v53  ;;  %v969_v58 = vsel %vm862_vm3, %v968_v54, %v951_v49  ;;  %v964_v59 = vrot.slane %v959_v56, 4  ;;  %v966_v60 = vrot.slane %v947_v55, 4 }
 0x5c0   : > { %981 = vrot.lane.b32.xlu0 %v971_v57, %s1535_s2  ;;  %977 = vrot.lane.b32.xlu1 %v969_v58, %s1536_s28 }
 0x5c1   : > { %v967_v61 = vsel %vm862_vm3, %v959_v56, %v966_v60  ;;  %v965_v62 = vsel %vm862_vm3, %v964_v59, %v947_v55 }
 0x5c2   : > { %973 = vrot.lane.b32.xlu2 %v967_v61, %s1537_s29 }
 0x61c   : > { %v974_v1 = vpop.permute.xlu2 %973 }
 0x61d   : > { %v984_v2 = vsel %vm444_vm2, %v965_v62, %v974_v1 }
 0x632   : > { %v982_v3 = vpop.permute.xlu0 %981  ;;  %v978_v4 = vpop.permute.xlu1 %977 }
 0x633   : > { %v986_v5 = vsel %vm985_vm4, %v984_v2, %v978_v4 }
 0x634   : > { %v988_v6 = vsel %vm987_vm5, %v986_v5, %v982_v3 }
 0x635   : > { %v989_v7 = vpack.c.bf16 %v988_v6, %v988_v6 }
 0x637   : > { %1188 = vmatmul.msk.bf16.vlgmr.msra.gmra.mxu2 %vm330_vm0, %v989_v7 }
 0x6ba   : > { %v1022_v9 = vpop.f32.mrf.mxu2 }
 0x6bb   : > { %v1023_v10 = vadd.f32 %v1307_v8, %v1022_v9 }
 0x6bd   : > { %1026 = vst.msk [vmem:[%s309_s26] sm:$0xff] %vm330_vm0, %v1023_v10 }
 0x6be   : > { %1471 = shalt.err (!%p1468_p8)
}
 0x6bf   : > { %1209 = dma.vmem_to_hbm [thread:$0]  (%p1639_p4), %s1041_s15, 128, %s1043_s10, %s1028_s25  }
 0x6c2   : > { %v1024_v11 = vpop.f32.mrf.mxu2 }
 0x6c3 PF: > { %s1054_s3 = sand.u32 1, %s1510_s18   ;;  %p1835_p10 = scmp.ge.s32.totalorder %s1522_s21, 2 }
 0x6c4   : > { %s1055_s28 = scalar_lea.sflag [#allocation4], %s1054_s3 }
 0x6c5   : > { %p1226_p13 = pnand %p1835_p10, %p1643_p6 }
 0x6c7   : > { %p1227_p11 = pneg %p1226_p13 }
 0x6c9   : > { %1505 = dma.done.wait (%p1227_p11), %s1055_s28, 128  }
 0x6ca   : > { %1507 = vsyncadd (%p1227_p11), %s1055_s28, 4294967168  ;;  %s1836_s29 = sld [smem:[#allocation16_spill]]  ;;  %p22_p0 = scmp.ge.s32.totalorder %s1611_s12, 4  }
 0x6cb   : > { %s1837_s18 = smov %s1514_s19  ;;  %s1838_s19 = smov %s1518_s20 }
 0x6cc   : > { %s1840_s21 = smov %s1611_s12  ;;  %24 = sbr.rel (!%p22_p0) target bundleno = 11 (0xb), region = 106 }
 0x6d0   : > { %s1839_s20 = smov %s1836_s29 }
 0x6d1   :  { %1061 = vsyncpa [#allocation3], 1 }
 0x6d2   :  { %1063 = vsyncpa [#allocation3 + $0x1], 1 }
 0x6d3   :  { %1064 = vsyncpa [#allocation6], 1 }
 0x6d4   :  { %1066 = vsyncpa [#allocation6 + $0x1], 1 }
 0x6d5   :  { %1067 = vsyncpa [#allocation9], 1 }
 0x6d6   :  { %1068 = vsyncpa [#allocation4], 1 }
 0x6d7   :  { %1070 = vsyncpa [#allocation4 + $0x1], 1 }

</bundles_post_ra>
